<compile_context>
chip_gen: v7x
topology: tpu7x:2x2x1
jax: 0.10.0
libtpu: 0.0.40
codegen_flags: <defaults>
</compile_context>

<pallas_src>
import functools

import jax
import jax.numpy as jnp
from jax.experimental import pallas as pl
from jax.experimental.pallas import tpu as pltpu


def _round_up(x, m):
    return ((x + m - 1) // m) * m


def _deepemd_kernel(x_ref, xa_ref, w_ref, b_ref, logits_ref, kl_ref, *,
                    inv_hw, total_n, tile_n):
    # x_ref / xa_ref : (TILE_N, C, HW)   -- native NCHW layout (HW on lanes)
    # w_ref          : (C, NC_pad)       -- pre-transposed, zero-padded Linear weight
    # b_ref          : (1, NC_pad)
    # logits_ref     : (TILE_N, NC_pad)
    # kl_ref         : (1, 8, 128)       -- per-tile partial KL (broadcast-filled)

    # Flatten: AdaptiveAvgPool2d((1,1)) == mean over spatial.  Lane reduce (XLU has
    # slack in this mem-bound kernel) with f32 accumulation, no full-tile upcast.
    f1 = jnp.sum(x_ref[...], axis=-1, dtype=jnp.float32) * inv_hw   # (TILE_N, C)
    f2 = jnp.sum(xa_ref[...], axis=-1, dtype=jnp.float32) * inv_hw  # (TILE_N, C)

    # classifier: nn.Linear(C, num_classes).  Feed the MXU in the weight's dtype
    # (no per-step full-weight upcast); accumulate in f32; lane-dense padded logits.
    logits = jnp.dot(f1.astype(w_ref.dtype), w_ref[...],
                     preferred_element_type=jnp.float32)
    logits = logits + b_ref[...].astype(jnp.float32)
    logits_ref[...] = logits.astype(logits_ref.dtype)

    # kl(x, y) = F.kl_div(softmax(x).log(), softmax(y), reduction='sum')
    #          = sum_{n,c} q * (log q - log p),  p = softmax(f1), q = softmax(f2)
    m1 = jnp.max(f1, axis=-1, keepdims=True)
    m2 = jnp.max(f2, axis=-1, keepdims=True)
    e1 = jnp.exp(f1 - m1)
    e2 = jnp.exp(f2 - m2)
    s1 = jnp.sum(e1, axis=-1, keepdims=True)
    s2 = jnp.sum(e2, axis=-1, keepdims=True)
    lp = (f1 - m1) - jnp.log(s1)                      # log_softmax(f1)
    lq = (f2 - m2) - jnp.log(s2)                      # log_softmax(f2)
    q = e2 * pl.reciprocal(s2, approx=False)          # softmax(f2)

    # Mask out-of-range batch rows of the last (partial) tile: inputs are NOT padded
    # in HBM, so those rows contain unspecified data.
    rows_left = total_n - pl.program_id(0) * tile_n
    row_ids = jax.lax.broadcasted_iota(jnp.int32, (tile_n, 1), 0)
    valid = row_ids < rows_left

    kl_terms = jnp.where(jnp.logical_and(valid, q > 0.0), q * (lq - lp), 0.0)
    kl = jnp.sum(kl_terms)

    # Per-tile partial; broadcast-fill the (1, 8, 128) slab (wrapper reads [i, 0, 0]).
    kl_ref[...] = jnp.broadcast_to(kl.reshape(1, 1, 1), kl_ref.shape).astype(kl_ref.dtype)


def _resident_spec(shape):
    """Constant-index_map (resident) BlockSpec; single-buffered if supported."""
    idx = lambda i: (0,) * len(shape)
    try:
        return pl.BlockSpec(shape, idx, pipeline_mode=pl.Buffered(1))
    except (TypeError, AttributeError):
        return pl.BlockSpec(shape, idx)


@functools.partial(jax.jit, static_argnames=("num_classes",))
def deepemd_forward(img, target, img_aug, w, b, *, num_classes):
    # TODO(synk): the resnet backbone (resnet18/34/50/... encoders) is an external module;
    # `img` / `img_aug` are treated as the encoder's final NCHW feature maps.
    N, C, H, W = img.shape
    HW = H * W
    itemsize = jnp.dtype(img.dtype).itemsize

    # Native layout, no transpose / no pad: a free reshape to (N, C, HW).
    x = img.reshape(N, C, HW)
    xa = img_aug.reshape(N, C, HW)

    # ---- tile sizing -------------------------------------------------------
    try:
        vmem_cap = int(pltpu.get_tpu_info().vmem_capacity_bytes)
    except Exception:
        vmem_cap = 64 * 1024 * 1024        # conservative default (v7x per-TC)

    # VMEM footprint of one batch row inside a block (sublane / lane padding).
    sub = 8 * max(1, 4 // itemsize)
    row_bytes_vmem = _round_up(C, sub) * _round_up(HW, 128) * itemsize
    row_bytes_hbm = C * HW * itemsize

    # Per-input-buffer budget: ~1/12 of VMEM (2 streams x 2 buffers fit easily),
    # clamped to [4 MiB, 16 MiB]  ->  ~5 MiB on v7x, ~10+ MiB on v5e/v6e.
    budget = min(16 * 1024 * 1024, max(4 * 1024 * 1024, vmem_cap // 12))
    rows = max(1, budget // row_bytes_vmem)
    if rows >= 8:
        rows = (rows // 8) * 8
    tile_n = int(min(rows, N))
    # Guarantee >= 2 balanced tiles for reasonable batches (v7x megacore sharding).
    if N > 8:
        tile_n = min(tile_n, _round_up(-(-N // 2), 8))
    tile_n = max(tile_n, 1)
    grid_n = -(-N // tile_n)
    n_pad = grid_n * tile_n

    # Pad classes to a multiple of 128: lane-dense logits stores, non-trivial MXU N dim.
    nc_pad = _round_up(num_classes, 128)
    w_itemsize = jnp.dtype(w.dtype).itemsize
    wt = jnp.zeros((C, nc_pad), w.dtype).at[:, :num_classes].set(jnp.transpose(w))
    b2 = jnp.zeros((1, nc_pad), b.dtype).at[:, :num_classes].set(b.reshape(1, num_classes))

    # VMEM accounting: double-buffered inputs + single-buffered weights + outputs.
    w_sub = 8 * max(1, 4 // w_itemsize)
    wt_vmem = _round_up(C, w_sub) * nc_pad * w_itemsize
    b_vmem = 8 * nc_pad * w_itemsize
    logits_vmem = 2 * _round_up(tile_n, 8) * nc_pad * 4
    kl_vmem = 2 * 8 * 128 * 4
    vmem_need = 2 * 2 * tile_n * row_bytes_vmem + wt_vmem + b_vmem + logits_vmem + kl_vmem
    vmem_limit = int(max(16 * 1024 * 1024,
                         min(vmem_cap - 16 * 1024 * 1024,
                             (3 * vmem_need) // 2 + 2 * 1024 * 1024)))

    cost = pl.CostEstimate(
        flops=int(2 * N * C * nc_pad + 4 * N * C * HW + 16 * N * C),
        transcendentals=int(2 * N * C + 8 * N),
        bytes_accessed=int(2 * N * row_bytes_hbm
                           + (C * nc_pad + nc_pad) * w_itemsize
                           + n_pad * nc_pad * 4
                           + grid_n * 8 * 128 * 4),
    )

    kernel = functools.partial(_deepemd_kernel, inv_hw=1.0 / HW,
                               total_n=N, tile_n=tile_n)

    logits_pad, kl_parts = pl.pallas_call(
        kernel,
        grid=(grid_n,),
        out_shape=(
            jax.ShapeDtypeStruct((n_pad, nc_pad), jnp.float32),
            jax.ShapeDtypeStruct((grid_n, 8, 128), jnp.float32),
        ),
        in_specs=[
            pl.BlockSpec((tile_n, C, HW), lambda i: (i, 0, 0)),   # x   (native layout)
            pl.BlockSpec((tile_n, C, HW), lambda i: (i, 0, 0)),   # x_aug
            _resident_spec((C, nc_pad)),                          # W^T (resident)
            _resident_spec((1, nc_pad)),                          # bias (resident)
        ],
        out_specs=(
            pl.BlockSpec((tile_n, nc_pad), lambda i: (i, 0)),     # padded logits
            pl.BlockSpec((1, 8, 128), lambda i: (i, 0, 0)),       # per-tile KL partials
        ),
        compiler_params=pltpu.CompilerParams(
            dimension_semantics=("parallel",),
            vmem_limit_bytes=vmem_limit,
        ),
        cost_estimate=cost,
    )(x, xa, wt, b2)

    logits = logits_pad[:N, :num_classes]
    kl = jnp.sum(kl_parts[:, 0, 0])

    # forward returns (logits1, emd_logits, target)
    return logits, kl, target


if __name__ == "__main__":
    key = jax.random.PRNGKey(0)
    # small shapes consistent with the forward: encoder feature map (N, C, H, W)
    N, C, H, W = 2, 32, 8, 8
    num_classes = 8

    k1, k2, k3, k4 = jax.random.split(key, 4)
    img = jax.random.normal(k1, (N, C, H, W), jnp.float32)       # batch[0] (post-encoder)
    img_aug = jax.random.normal(k2, (N, C, H, W), jnp.float32)   # batch[2] (post-encoder)
    target = (jnp.arange(N, dtype=jnp.int32) % num_classes)      # batch[1]

    # deterministic nn.Linear(C, num_classes) init (uniform +/- 1/sqrt(C))
    bound = 1.0 / (C ** 0.5)
    w = jax.random.uniform(k3, (num_classes, C), jnp.float32, -bound, bound)
    b = jax.random.uniform(k4, (num_classes,), jnp.float32, -bound, bound)

    logits, kl, tgt = deepemd_forward(img, target, img_aug, w, b,
                                      num_classes=num_classes)
    jax.block_until_ready((logits, kl, tgt))

    # pure-JAX reference check
    f1 = img.reshape(N, C, -1).mean(-1)
    f2 = img_aug.reshape(N, C, -1).mean(-1)
    ref_logits = f1 @ w.T + b
    p = jax.nn.softmax(f1, axis=-1)
    q = jax.nn.softmax(f2, axis=-1)
    ref_kl = jnp.sum(q * (jnp.log(q) - jnp.log(p)))

    assert logits.shape == (N, num_classes), "logits shape mismatch"
    assert jnp.allclose(logits, ref_logits, atol=1e-4, rtol=1e-4), "logits mismatch"
    assert jnp.allclose(kl, ref_kl, atol=1e-5, rtol=1e-4), "kl mismatch"
    assert jnp.array_equal(tgt, target), "target passthrough mismatch"

    print("KERNEL_OK")
</pallas_src>

<mosaic_0001>
module attributes {stable_mosaic.version = 11 : i64} {
  func.func @_deepemd_kernel(%arg0: i32, %arg1: memref<2x32x64xf32, #tpu.memory_space<vmem>>, %arg2: memref<2x32x64xf32, #tpu.memory_space<vmem>>, %arg3: memref<32x128xf32, #tpu.memory_space<vmem>>, %arg4: memref<1x128xf32, #tpu.memory_space<vmem>>, %arg5: memref<2x128xf32, #tpu.memory_space<vmem>>, %arg6: memref<1x8x128xf32, #tpu.memory_space<vmem>>) attributes {dimension_semantics = [#tpu.dimension_semantics<parallel>], iteration_bounds = array<i64: 1>, scalar_prefetch = 0 : i64, scratch_operands = 0 : i64, tpu.core_type = #tpu.core_type<tc>, window_params = [{transform_indices = @transform_0, window_bounds = array<i64: 2, 32, 64>}, {transform_indices = @transform_1, window_bounds = array<i64: 2, 32, 64>}, {pipeline_mode = #tpu.pipeline_mode<synchronous>, transform_indices = @transform_2, window_bounds = array<i64: 32, 128>}, {pipeline_mode = #tpu.pipeline_mode<synchronous>, transform_indices = @transform_3, window_bounds = array<i64: 1, 128>}, {transform_indices = @transform_4, window_bounds = array<i64: 2, 128>}, {transform_indices = @transform_5, window_bounds = array<i64: 1, 8, 128>}]} {
    %c0 = arith.constant 0 : index
    %c0_0 = arith.constant 0 : index
    %c0_1 = arith.constant 0 : index
    %0 = vector.load %arg1[%c0, %c0_0, %c0_1] : memref<2x32x64xf32, #tpu.memory_space<vmem>>, vector<2x32x64xf32>
    %cst = arith.constant dense<0.000000e+00> : vector<2x32xf32>
    %1 = vector.multi_reduction <add>, %0, %cst [2] : vector<2x32x64xf32> to vector<2x32xf32>
    %cst_2 = arith.constant 1.562500e-02 : f32
    %2 = vector.broadcast %cst_2 : f32 to vector<2x32xf32>
    %3 = arith.mulf %1, %2 : vector<2x32xf32>
    %c0_3 = arith.constant 0 : index
    %c0_4 = arith.constant 0 : index
    %c0_5 = arith.constant 0 : index
    %4 = vector.load %arg2[%c0_3, %c0_4, %c0_5] : memref<2x32x64xf32, #tpu.memory_space<vmem>>, vector<2x32x64xf32>
    %cst_6 = arith.constant dense<0.000000e+00> : vector<2x32xf32>
    %5 = vector.multi_reduction <add>, %4, %cst_6 [2] : vector<2x32x64xf32> to vector<2x32xf32>
    %cst_7 = arith.constant 1.562500e-02 : f32
    %6 = vector.broadcast %cst_7 : f32 to vector<2x32xf32>
    %7 = arith.mulf %5, %6 : vector<2x32xf32>
    %c0_8 = arith.constant 0 : index
    %c0_9 = arith.constant 0 : index
    %8 = vector.load %arg3[%c0_8, %c0_9] : memref<32x128xf32, #tpu.memory_space<vmem>>, vector<32x128xf32>
    %cst_10 = arith.constant dense<0.000000e+00> : vector<2x128xf32>
    %9 = tpu.matmul %3, %8, %cst_10 {dimension_numbers = #tpu.dot_dimension_numbers<[1], [0], [0], [1], [0, 0, 1, 1], [], []>} : vector<2x32xf32>, vector<32x128xf32>, vector<2x128xf32> -> vector<2x128xf32>
    %c0_11 = arith.constant 0 : index
    %c0_12 = arith.constant 0 : index
    %10 = vector.load %arg4[%c0_11, %c0_12] : memref<1x128xf32, #tpu.memory_space<vmem>>, vector<1x128xf32>
    %11 = vector.broadcast %10 : vector<1x128xf32> to vector<2x128xf32>
    %12 = arith.addf %9, %11 : vector<2x128xf32>
    %c0_13 = arith.constant 0 : index
    %c0_14 = arith.constant 0 : index
    %13 = vector.load %arg5[%c0_13, %c0_14] : memref<2x128xf32, #tpu.memory_space<vmem>>, vector<2x128xf32>
    tpu.vector_store %arg5[%c0_13, %c0_14], %12 {strides = array<i32>} : memref<2x128xf32, #tpu.memory_space<vmem>>, vector<2x128xf32>,
    %cst_15 = arith.constant dense<0xFF800000> : vector<2xf32>
    %14 = vector.multi_reduction <maximumf>, %3, %cst_15 [1] : vector<2x32xf32> to vector<2xf32>
    %15 = vector.shape_cast %14 : vector<2xf32> to vector<2x1xf32>
    %cst_16 = arith.constant dense<0xFF800000> : vector<2xf32>
    %16 = vector.multi_reduction <maximumf>, %7, %cst_16 [1] : vector<2x32xf32> to vector<2xf32>
    %17 = vector.shape_cast %16 : vector<2xf32> to vector<2x1xf32>
    %18 = vector.broadcast %15 : vector<2x1xf32> to vector<2x32xf32>
    %19 = arith.subf %3, %18 : vector<2x32xf32>
    %20 = math.exp %19 : vector<2x32xf32>
    %21 = vector.broadcast %17 : vector<2x1xf32> to vector<2x32xf32>
    %22 = arith.subf %7, %21 : vector<2x32xf32>
    %23 = math.exp %22 : vector<2x32xf32>
    %cst_17 = arith.constant dense<0.000000e+00> : vector<2xf32>
    %24 = vector.multi_reduction <add>, %20, %cst_17 [1] : vector<2x32xf32> to vector<2xf32>
    %25 = vector.shape_cast %24 : vector<2xf32> to vector<2x1xf32>
    %cst_18 = arith.constant dense<0.000000e+00> : vector<2xf32>
    %26 = vector.multi_reduction <add>, %23, %cst_18 [1] : vector<2x32xf32> to vector<2xf32>
    %27 = vector.shape_cast %26 : vector<2xf32> to vector<2x1xf32>
    %28 = vector.broadcast %15 : vector<2x1xf32> to vector<2x32xf32>
    %29 = arith.subf %3, %28 : vector<2x32xf32>
    %30 = math.log %25 : vector<2x1xf32>
    %31 = vector.broadcast %30 : vector<2x1xf32> to vector<2x32xf32>
    %32 = arith.subf %29, %31 : vector<2x32xf32>
    %33 = vector.broadcast %17 : vector<2x1xf32> to vector<2x32xf32>
    %34 = arith.subf %7, %33 : vector<2x32xf32>
    %35 = math.log %27 : vector<2x1xf32>
    %36 = vector.broadcast %35 : vector<2x1xf32> to vector<2x32xf32>
    %37 = arith.subf %34, %36 : vector<2x32xf32>
    %38 = tpu.reciprocal %27 : vector<2x1xf32> -> vector<2x1xf32>
    %39 = vector.broadcast %38 : vector<2x1xf32> to vector<2x32xf32>
    %40 = arith.mulf %23, %39 : vector<2x32xf32>
    %c2_i32 = arith.constant 2 : i32
    %41 = arith.muli %arg0, %c2_i32 : i32
    %c2_i32_19 = arith.constant 2 : i32
    %42 = arith.subi %c2_i32_19, %41 : i32
    %43 = tpu.iota {dimensions = array<i32: 0>} : vector<2x1xi32>
    %44 = vector.broadcast %42 : i32 to vector<2x1xi32>
    %45 = arith.cmpi slt, %43, %44 : vector<2x1xi32>
    %cst_20 = arith.constant 0.000000e+00 : f32
    %46 = vector.broadcast %cst_20 : f32 to vector<2x32xf32>
    %47 = arith.cmpf ogt, %40, %46 : vector<2x32xf32>
    %48 = vector.broadcast %45 : vector<2x1xi1> to vector<2x32xi1>
    %49 = arith.andi %48, %47 : vector<2x32xi1>
    %50 = arith.subf %37, %32 : vector<2x32xf32>
    %51 = arith.mulf %40, %50 : vector<2x32xf32>
    %cst_21 = arith.constant 0.000000e+00 : f32
    %52 = vector.broadcast %cst_21 : f32 to vector<2x32xf32>
    %53 = arith.select %49, %51, %52 : vector<2x32xi1>, vector<2x32xf32>
    %54 = vector.shape_cast %53 : vector<2x32xf32> to vector<1x2x32xf32>
    %cst_22 = arith.constant dense<0.000000e+00> : vector<1xf32>
    %55 = vector.multi_reduction <add>, %54, %cst_22 [1, 2] : vector<1x2x32xf32> to vector<1xf32>
    %56 = vector.shape_cast %55 : vector<1xf32> to vector<1x1x1xf32>
    %57 = vector.extract %56[0, 0, 0] : f32 from vector<1x1x1xf32>
    %58 = vector.broadcast %57 : f32 to vector<1x1x1xf32>
    %59 = vector.shape_cast %58 : vector<1x1x1xf32> to vector<1x1x1xf32>
    %60 = vector.broadcast %59 : vector<1x1x1xf32> to vector<1x8x128xf32>
    %c0_23 = arith.constant 0 : index
    %c0_24 = arith.constant 0 : index
    %c0_25 = arith.constant 0 : index
    %61 = vector.load %arg6[%c0_23, %c0_24, %c0_25] : memref<1x8x128xf32, #tpu.memory_space<vmem>>, vector<1x8x128xf32>
    tpu.vector_store %arg6[%c0_23, %c0_24, %c0_25], %60 {strides = array<i32>} : memref<1x8x128xf32, #tpu.memory_space<vmem>>, vector<1x8x128xf32>,
    return
  }
  func.func @transform_0(%arg0: i32) -> (i32, i32, i32) {
    %c0_i32 = arith.constant 0 : i32
    %c0_i32_0 = arith.constant 0 : i32
    %c0_i32_1 = arith.constant 0 : i32
    return %arg0, %c0_i32, %c0_i32_0 : i32, i32, i32
  }
  func.func @transform_1(%arg0: i32) -> (i32, i32, i32) {
    %c0_i32 = arith.constant 0 : i32
    %c0_i32_0 = arith.constant 0 : i32
    %c0_i32_1 = arith.constant 0 : i32
    return %arg0, %c0_i32, %c0_i32_0 : i32, i32, i32
  }
  func.func @transform_2(%arg0: i32) -> (i32, i32) {
    %c0_i32 = arith.constant 0 : i32
    %c0_i32_0 = arith.constant 0 : i32
    %c0_i32_1 = arith.constant 0 : i32
    return %c0_i32, %c0_i32_0 : i32, i32
  }
  func.func @transform_3(%arg0: i32) -> (i32, i32) {
    %c0_i32 = arith.constant 0 : i32
    %c0_i32_0 = arith.constant 0 : i32
    %c0_i32_1 = arith.constant 0 : i32
    return %c0_i32, %c0_i32_0 : i32, i32
  }
  func.func @transform_4(%arg0: i32) -> (i32, i32) {
    %c0_i32 = arith.constant 0 : i32
    %c0_i32_0 = arith.constant 0 : i32
    return %arg0, %c0_i32 : i32, i32
  }
  func.func @transform_5(%arg0: i32) -> (i32, i32, i32) {
    %c0_i32 = arith.constant 0 : i32
    %c0_i32_0 = arith.constant 0 : i32
    %c0_i32_1 = arith.constant 0 : i32
    return %arg0, %c0_i32, %c0_i32_0 : i32, i32, i32
  }
}

</mosaic_0001>

<bundles_post_ra>
// kernel: deepemd_forward.1
= control target key start
LH: loop header
LB: loop body
LE: loop exit
PB: predicated region body
PF: predicated region fallthrough
CT: control target
= control target key end

     0   :  { %vm28_vm0 = vcmask 523264   ;;  %s1305_s0 = inlined_call_operand.vmem [shape: f32[2,32,64], index: 0, kind: input, shape index: {}]   ;;  %s1306_s1 = inlined_call_operand.vmem [shape: f32[2,32,64], index: 1, kind: input, shape index: {}]   ;;  %s1307_s2 = inlined_call_operand.vmem [shape: f32[32,128], index: 2, kind: input, shape index: {}]   ;;  %s1308_s3 = inlined_call_operand.vmem [shape: f32[1,128], index: 3, kind: input, shape index: {}]   ;;  %s1309_s4 = inlined_call_operand.hbm [shape: f32[2,128], index: 4, kind: output, shape index: {0}]   ;;  %s1310_s5 = inlined_call_operand.vmem [shape: f32[1,8,128], index: 5, kind: output, shape index: {1}]  }
   0x1   :  { %v24_v0 = vld [vmem:[%s1305_s0 + $0x20] sm:$0xff]  ;;  %v25_v2 = vld [vmem:[%s1305_s0 + $0x28] sm:$0xff] }
   0x2   :  { %v20_v1 = vld [vmem:[%s1305_s0] sm:$0xff]  ;;  %v41_v3 = vsel %vm28_vm0, %v24_v0, 0.0  ;;  %v21_v5 = vld [vmem:[%s1305_s0 + $0x8] sm:$0xff]  ;;  %v44_v6 = vsel %vm28_vm0, %v25_v2, 0.0 }
   0x3   :  { %v29_v4 = vsel %vm28_vm0, %v20_v1, 0.0  ;;  %42 = vadd.xlane.f32.xlu1 %v41_v3  ;;  %v32_v7 = vsel %vm28_vm0, %v21_v5, 0.0  ;;  %v62_v8 = vld [vmem:[%s1306_s1 + $0x8] sm:$0xff]  ;;  %v61_v9 = vld [vmem:[%s1306_s1] sm:$0xff] }
   0x4   :  { %30 = vadd.xlane.f32.xlu0 %v29_v4 }
   0x7   :  { %45 = vadd.xlane.f32.xlu1 %v44_v6 }
   0x8   :  { %33 = vadd.xlane.f32.xlu0 %v32_v7 }
   0x9   :  { %11 = vsyncpa [#allocation3], 0  ;;  %v72_v10 = vsel %vm28_vm0, %v62_v8, 0.0  ;;  %v69_v11 = vsel %vm28_vm0, %v61_v9, 0.0  ;;  %v66_v12 = vld [vmem:[%s1306_s1 + $0x28] sm:$0xff]  ;;  %v65_v13 = vld [vmem:[%s1306_s1 + $0x20] sm:$0xff]  ;;  %v120_v44 = vlaneseq }
   0xa   :  { %v84_v14 = vsel %vm28_vm0, %v66_v12, 0.0  ;;  %v81_v15 = vsel %vm28_vm0, %v65_v13, 0.0  ;;  %v26_v16 = vld [vmem:[%s1305_s0 + $0x30] sm:$0xff]  ;;  %v27_v24 = vld [vmem:[%s1305_s0 + $0x38] sm:$0xff]  ;;  %v101_v32 = vld [vmem:[%s1307_s2] sm:$0xff]  ;;  %v883_v35 = vmov 0.0|0.0  }
   0xb   :  { %73 = vadd.xlane.f32.xlu1 %v72_v10  ;;  %v22_v17 = vld [vmem:[%s1305_s0 + $0x10] sm:$0xff]  ;;  %v47_v18 = vsel %vm28_vm0, %v26_v16, 0.0  ;;  %v23_v25 = vld [vmem:[%s1305_s0 + $0x18] sm:$0xff]  ;;  %v50_v26 = vsel %vm28_vm0, %v27_v24, 0.0  ;;  %v102_v33 = vld [vmem:[%s1307_s2 + $0x8] sm:$0xff]  ;;  %806 = vmatprep.subr.bf16.mxu0 %v883_v35  ;;  %vm884_vm1 = vmmov 0  }
   0xc   :  { %70 = vadd.xlane.f32.xlu0 %v69_v11  ;;  %v35_v19 = vsel %vm28_vm0, %v22_v17, 0.0  ;;  %v67_v20 = vld [vmem:[%s1306_s1 + $0x30] sm:$0xff]  ;;  %v38_v27 = vsel %vm28_vm0, %v23_v25, 0.0  ;;  %v68_v28 = vld [vmem:[%s1306_s1 + $0x38] sm:$0xff]  ;;  %v807_v34 = vpack.c.bf16 %v102_v33, %v101_v32  ;;  %v885_v39 = vmov 0.0  }
   0xd   :  { %v63_v21 = vld [vmem:[%s1306_s1 + $0x10] sm:$0xff]  ;;  %v87_v22 = vsel %vm28_vm0, %v67_v20, 0.0  ;;  %v64_v29 = vld [vmem:[%s1306_s1 + $0x18] sm:$0xff]  ;;  %v90_v30 = vsel %vm28_vm0, %v68_v28, 0.0  ;;  %803 = vmatprep.mubr.msk.f32.mxu0 %vm884_vm1, %v885_v39  ;;  %v121_v47 = vand.u32 127, %v120_v44  ;;  %v994_v51 = vshrl.u32 %v120_v44, 7 }
   0xe   :  { %v75_v23 = vsel %vm28_vm0, %v63_v21, 0.0  ;;  %v78_v31 = vsel %vm28_vm0, %v64_v29, 0.0  ;;  %808 = vmatpush3.bf16.msra.mxu0 %v807_v34  ;;  %v103_v36 = vld [vmem:[%s1307_s2 + $0x10] sm:$0xff]  ;;  %v104_v37 = vld [vmem:[%s1307_s2 + $0x18] sm:$0xff]  ;;  %vm131_vm2 = vcmask 130112   ;;  %vm138_vm3 = vcmask 195712  }
   0xf   :  { %85 = vadd.xlane.f32.xlu1 %v84_v14  ;;  %809 = vmatprep.subr.bf16.mxu0 %v883_v35  ;;  %v810_v38 = vpack.c.bf16 %v104_v37, %v103_v36  ;;  %v126_v50 = vadd.s32 4294967288, %v121_v47  ;;  %v133_v52 = vadd.s32 4294967280, %v121_v47  ;;  %v140_v55 = vadd.s32 4294967272, %v121_v47 }
  0x10   :  { %82 = vadd.xlane.f32.xlu0 %v81_v15  ;;  %v1004_v59 = vsub.s32 %v121_v47, %v994_v51  ;;  %vm145_vm4 = vcmask 261312   ;;  %vm166_vm5 = vcmask 1041409   ;;  %vm168_vm6 = vcmask 261120  }
  0x11   :  { %v997_v56 = vsub.s32 %v126_v50, %v994_v51  ;;  %v1011_v62 = vsub.s32 %v133_v52, %v994_v51  ;;  %v1018_v3 = vsub.s32 %v140_v55, %v994_v51  ;;  %vm243_vm7 = vcmask 254976  }
  0x12   :  { %811 = vmatpush3.bf16.msra.mxu0 %v810_v38  ;;  %v886_v50 = vmov 0   ;;  %v1089_v52 = vsub.s32 0, %v994_v51  ;;  %vm585_vm0 = vcmp.lt.s32.totalorder %v994_v51, 2 }
  0x13   :  { %48 = vadd.xlane.f32.xlu1 %v47_v18  ;;  %819 = vset.pattern.permute.xlu0 %v886_v50 }
  0x14   :  { %36 = vadd.xlane.f32.xlu0 %v35_v19  ;;  %820 = vset.pattern.permute.xlu1 %v886_v50 }
  0x17   :  { %88 = vadd.xlane.f32.xlu1 %v87_v22 }
  0x18   :  { %76 = vadd.xlane.f32.xlu0 %v75_v23 }
  0x1b   :  { %51 = vadd.xlane.f32.xlu1 %v50_v26 }
  0x1c   :  { %39 = vadd.xlane.f32.xlu0 %v38_v27 }
  0x1f   :  { %91 = vadd.xlane.f32.xlu1 %v90_v30 }
  0x20   :  { %79 = vadd.xlane.f32.xlu0 %v78_v31 }
  0x90   :  { %v43_v40 = vpop.xlane.xlu1 %42 }
  0x91   :  { %v31_v41 = vpop.xlane.xlu0 %30  ;;  %v1006_v60 = vmul.f32 0.015625, %v43_v40 }
  0x92   :  { %v1008_v61 = vmul.f32 0.015625, %v31_v41 }
  0x93   :  { %v150_v8 = vrot.slane %v1006_v60, %v1004_v59 }
  0x94   :  { %v46_v42 = vpop.xlane.xlu1 %45  ;;  %v125_v9 = vrot.slane %v1008_v61, %v1004_v59 }
  0x95   :  { %v34_v43 = vpop.xlane.xlu0 %33  ;;  %v999_v57 = vmul.f32 0.015625, %v46_v42 }
  0x96   :  { %v1001_v58 = vmul.f32 0.015625, %v34_v43 }
  0x97   :  { %v154_v4 = vrot.slane %v999_v57, %v997_v56 }
  0x98   :  { %v74_v45 = vpop.xlane.xlu1 %73  ;;  %v130_v5 = vrot.slane %v1001_v58, %v997_v56 }
  0x99   :  { %v71_v46 = vpop.xlane.xlu0 %70  ;;  %v1024_v6 = vmul.f32 0.015625, %v74_v45  ;;  %v155_v20 = vsel %vm131_vm2, %v154_v4, %v150_v8 }
  0x9a   :  { %v1026_v7 = vmul.f32 0.015625, %v71_v46  ;;  %v132_v21 = vsel %vm131_vm2, %v130_v5, %v125_v9 }
  0x9b   :  { %v262_v22 = vrot.slane %v1024_v6, %v997_v56 }
  0x9c   :  { %v86_v48 = vpop.xlane.xlu1 %85  ;;  %v258_v23 = vrot.slane %v1026_v7, %v1004_v59 }
  0x9d   :  { %v83_v49 = vpop.xlane.xlu0 %82  ;;  %v1032_v10 = vmul.f32 0.015625, %v86_v48 }
  0x9e   :  { %v1034_v11 = vmul.f32 0.015625, %v83_v49  ;;  %v263_v38 = vsel %vm131_vm2, %v262_v22, %v258_v23 }
  0x9f   :  { %v281_v24 = vrot.slane %v1032_v10, %v997_v56 }
  0xa0   :  { %v49_v53 = vpop.xlane.xlu1 %48  ;;  %v277_v25 = vrot.slane %v1034_v11, %v1004_v59 }
  0xa1   :  { %v37_v54 = vpop.xlane.xlu0 %36  ;;  %v1013_v63 = vmul.f32 0.015625, %v49_v53  ;;  %v1092_v53 = vsub.s32 1, %v994_v51 }
  0xa2   :  { %v1015_v0 = vmul.f32 0.015625, %v37_v54  ;;  %v282_v40 = vsel %vm131_vm2, %v281_v24, %v277_v25 }
  0xa3   :  { %v159_v12 = vrot.slane %v1013_v63, %v1011_v62 }
  0xa4   :  { %v89_v1 = vpop.xlane.xlu1 %88  ;;  %v137_v13 = vrot.slane %v1015_v0, %v1011_v62 }
  0xa5   :  { %v77_v2 = vpop.xlane.xlu0 %76  ;;  %v1040_v14 = vmul.f32 0.015625, %v89_v1  ;;  %v160_v28 = vsel %vm138_vm3, %v159_v12, %v155_v20 }
  0xa6   :  { %v1042_v15 = vmul.f32 0.015625, %v77_v2  ;;  %v139_v29 = vsel %vm138_vm3, %v137_v13, %v132_v21 }
  0xa7   :  { %v286_v30 = vrot.slane %v1040_v14, %v1011_v62 }
  0xa8   :  { %v52_v16 = vpop.xlane.xlu1 %51  ;;  %v267_v31 = vrot.slane %v1042_v15, %v1011_v62 }
  0xa9   :  { %v40_v17 = vpop.xlane.xlu0 %39  ;;  %v1044_v18 = vmul.f32 0.015625, %v52_v16  ;;  %v287_v45 = vsel %vm138_vm3, %v286_v30, %v282_v40 }
  0xaa   :  { %v1046_v19 = vmul.f32 0.015625, %v40_v17  ;;  %v268_v44 = vsel %vm138_vm3, %v267_v31, %v263_v38 }
  0xab   :  { %v164_v26 = vrot.slane %v1044_v18, %v1018_v3 }
  0xac   :  { %v144_v27 = vrot.slane %v1046_v19, %v1018_v3  ;;  %v92_v32 = vpop.xlane.xlu1 %91 }
  0xad   :  { %v80_v33 = vpop.xlane.xlu0 %79  ;;  %v100_v34 = vmul.f32 0.015625, %v92_v32  ;;  %v165_v37 = vsel %vm145_vm4, %v164_v26, %v160_v28 }
  0xae   :  { %v1068_v35 = vmul.f32 0.015625, %v80_v33  ;;  %v146_v36 = vsel %vm145_vm4, %v144_v27, %v139_v29 }
  0xaf   :  { %v167_v39 = vsel %vm166_vm5, %v165_v37, %v146_v36  ;;  %v291_v41 = vrot.slane %v100_v34, %v1018_v3 }
  0xb0   :  { %v272_v42 = vrot.slane %v1068_v35, %v1018_v3  ;;  %804 = vmatmul.mubr.msk.f32.vlgmr.msra.gmra.mrb[0].mxu0 %vm168_vm6, %v167_v39  ;;  %v244_v43 = vsel %vm243_vm7, %v167_v39, -inf }
  0xb1   :  { %245 = vmax.xlane.f32.xlu0 %v244_v43  ;;  %v292_v47 = vsel %vm145_vm4, %v291_v41, %v287_v45 }
  0xb2   :  { %v273_v46 = vsel %vm145_vm4, %v272_v42, %v268_v44 }
  0xb3   :  { %v293_v48 = vsel %vm166_vm5, %v292_v47, %v273_v46 }
  0xb4   :  { %v295_v49 = vsel %vm243_vm7, %v293_v48, -inf  ;;  %v788_v48 = vld [vmem:[%s1308_s3] ss:$0 sm:$0xff]  ;;  %s887_s3 = smov [#allocation2]  }
  0xb5   :  { %296 = vmax.xlane.f32.xlu1 %v295_v49  ;;  %s776_s7 = sshll.u32 %s887_s3, 4  ;;  %s777_s7 = int_to_ptr.vmem [resolvable:$true] %s776_s7 }
  0xb6   :  { %s859_s8 = scalar_lea.vmem %s777_s7, 32  ;;  %p864_p1 = scmp.lt.s32.totalorder %s777_s7, %s777_s7 }
  0xb7   :  { %p860_p0 = scmp.ne.s32.totalorder %s777_s7, %s859_s8  ;;  %p865_p2 = scmp.lt.s32.totalorder %s859_s8, %s859_s8 }
  0xb9   :  { %p866_p3 = por %p865_p2, %p864_p1 }
  0xbb   :  { %p867_p4 = pnand %p866_p3, %p860_p0 }
 0x13e   :  { %v246_v54 = vpop.xlane.xlu0 %245 }
 0x13f   :  { %v302_v55 = vrot.slane %v246_v54, %v1089_v52  ;;  %v306_v1 = vrot.slane %v246_v54, %v1092_v53 }
 0x141   :  { %v1097_v2 = vsub.f32 %v1008_v61, %v302_v55  ;;  %v1100_v4 = vsub.f32 %v1001_v58, %v302_v55  ;;  %v1103_v5 = vsub.f32 %v1006_v60, %v306_v1  ;;  %v1106_v8 = vsub.f32 %v1013_v63, %v306_v1 }
 0x142   :  { %v297_v13 = vpop.xlane.xlu1 %296  ;;  %v1111_v16 = vsub.f32 %v999_v57, %v306_v1  ;;  %v1129_v24 = vsub.f32 %v1044_v18, %v306_v1  ;;  %v1145_v32 = vsub.f32 %v1015_v0, %v302_v55  ;;  %v1162_v39 = vsub.f32 %v1046_v19, %v302_v55 }
 0x143   :  { %v317_v9 = vmul.f32 1.442695, %v1097_v2  ;;  %v319_v12 = vmul.f32 1.442695, %v1100_v4  ;;  %v325_v61 = vmul.f32 1.442695, %v1103_v5  ;;  %v337_v58 = vrot.slane %v297_v13, %v1089_v52 }
 0x144   :  { %v329_v60 = vmul.f32 1.442695, %v1106_v8  ;;  %v341_v17 = vrot.slane %v297_v13, %v1092_v53  ;;  %v327_v63 = vmul.f32 1.442695, %v1111_v16  ;;  %v321_v36 = vmul.f32 1.442695, %v1145_v32 }
 0x145   :  { %821 = vpow2.f32 %v317_v9  ;;  %v1119_v20 = vsub.f32 %v1026_v7, %v337_v58  ;;  %v1125_v57 = vsub.f32 %v1024_v6, %v337_v58  ;;  %v331_v6 = vmul.f32 1.442695, %v1129_v24 }
 0x146   :  { %823 = vpow2.f32 %v319_v12  ;;  %v1122_v21 = vsub.f32 %v1040_v14, %v341_v17  ;;  %v1133_v7 = vsub.f32 %v1034_v11, %v341_v17  ;;  %v1137_v27 = vsub.f32 %v100_v34, %v341_v17 }
 0x147   :  { %825 = vpow2.f32 %v325_v61  ;;  %v352_v22 = vmul.f32 1.442695, %v1119_v20  ;;  %v354_v14 = vmul.f32 1.442695, %v1125_v57  ;;  %v1140_v18 = vsub.f32 %v1032_v10, %v341_v17 }
 0x148   :  { %827 = vpow2.f32 %v329_v60  ;;  %v364_v25 = vmul.f32 1.442695, %v1122_v21  ;;  %v360_v30 = vmul.f32 1.442695, %v1133_v7  ;;  %v366_v11 = vmul.f32 1.442695, %v1137_v27 }
 0x149   :  { %829 = vpow2.f32 %v327_v63  ;;  %v362_v33 = vmul.f32 1.442695, %v1140_v18  ;;  %v1155_v37 = vsub.f32 %v1042_v15, %v337_v58  ;;  %v323_v15 = vmul.f32 1.442695, %v1162_v39 }
 0x14a   :  { %831 = vpow2.f32 %v352_v22  ;;  %v1172_v43 = vsub.f32 %v1068_v35, %v337_v58 }
 0x14b   :  { %833 = vpow2.f32 %v364_v25  ;;  %v356_v40 = vmul.f32 1.442695, %v1155_v37 }
 0x14c   :  { %835 = vpow2.f32 %v354_v14  ;;  %v358_v44 = vmul.f32 1.442695, %v1172_v43 }
 0x14d   :  { %837 = vpow2.f32 %v331_v6 }
 0x14e   :  { %839 = vpow2.f32 %v360_v30 }
 0x14f   :  { %v822_v23 = vpop.eup %821  ;;  %841 = vpow2.f32 %v366_v11 }
 0x150   :  { %v824_v26 = vpop.eup %823  ;;  %377 = vperm.xlu0 %819, %v822_v23   ;;  %843 = vpow2.f32 %v362_v33 }
 0x151   :  { %380 = vperm.xlu1 %820, %v824_v26   ;;  %v826_v28 = vpop.eup %825  ;;  %845 = vpow2.f32 %v321_v36 }
 0x152   :  { %v828_v29 = vpop.eup %827  ;;  %847 = vpow2.f32 %v356_v40 }
 0x153   :  { %v830_v31 = vpop.eup %829  ;;  %849 = vpow2.f32 %v323_v15 }
 0x154   :  { %395 = vperm.xlu0 %819, %v828_v29   ;;  %v1148_v34 = vpop.eup %831  ;;  %851 = vpow2.f32 %v358_v44 }
 0x155   :  { %389 = vperm.xlu1 %820, %v826_v28   ;;  %v1150_v10 = vpop.eup %833 }
 0x156   :  { %v1158_v0 = vpop.eup %835 }
 0x157   :  { %v838_v38 = vpop.eup %837 }
 0x158   :  { %470 = vperm.xlu0 %819, %v1150_v10   ;;  %v1165_v41 = vpop.eup %839 }
 0x159   :  { %392 = vperm.xlu1 %820, %v830_v31   ;;  %v1167_v42 = vpop.eup %841 }
 0x15a   :  { %v1175_v19 = vpop.eup %843 }
 0x15b   :  { %v846_v45 = vpop.eup %845 }
 0x15c   :  { %398 = vperm.xlu0 %819, %v838_v38   ;;  %v1179_v46 = vpop.eup %847 }
 0x15d   :  { %452 = vperm.xlu1 %820, %v1148_v34   ;;  %v850_v47 = vpop.eup %849 }
 0x15e   :  { %v1182_v35 = vpop.eup %851 }
 0x160   :  { %473 = vperm.xlu0 %819, %v1167_v42  }
 0x161   :  { %455 = vperm.xlu1 %820, %v1158_v0  }
 0x165   :  { %464 = vperm.xlu1 %820, %v1165_v41  }
 0x169   :  { %467 = vperm.xlu1 %820, %v1175_v19  }
 0x16d   :  { %383 = vperm.xlu1 %820, %v846_v45  }
 0x171   :  { %458 = vperm.xlu1 %820, %v1179_v46  }
 0x175   :  { %386 = vperm.xlu1 %820, %v850_v47  }
 0x179   :  { %461 = vperm.xlu1 %820, %v1182_v35  }
 0x183   :  { %v237_v49 = vpop.f32.mrb[0].mxu0 }
 0x184   :  { %v238_v54 = vadd.f32 %v788_v48, %v237_v49  ;;  %v805_v55 = vpop.f32.mrb[1].mxu0 }
 0x186   :  { %241 = vst [vmem:[#allocation2] sm:$0x3] %v238_v54 }
 0x1cf   :  { %v378_v61 = vpop.permute.xlu0 %377 }
 0x1d0   :  { %v381_v1 = vpop.permute.xlu1 %380  ;;  %v403_v28 = vrot.slane %v378_v61, %v1004_v59 }
 0x1d1   :  { %v407_v6 = vrot.slane %v381_v1, %v997_v56 }
 0x1d3   :  { %v396_v60 = vpop.permute.xlu0 %395  ;;  %v408_v15 = vsel %vm131_vm2, %v407_v6, %v403_v28 }
 0x1d4   :  { %v390_v9 = vpop.permute.xlu1 %389  ;;  %v431_v38 = vrot.slane %v396_v60, %v1011_v62 }
 0x1d5   :  { %v422_v29 = vrot.slane %v390_v9, %v1004_v59 }
 0x1d7   :  { %v471_v22 = vpop.permute.xlu0 %470 }
 0x1d8   :  { %v393_v12 = vpop.permute.xlu1 %392  ;;  %v506_v48 = vrot.slane %v471_v22, %v1011_v62 }
 0x1d9   :  { %v426_v25 = vrot.slane %v393_v12, %v997_v56 }
 0x1db   :  { %v399_v26 = vpop.permute.xlu0 %398  ;;  %v427_v31 = vsel %vm131_vm2, %v426_v25, %v422_v29 }
 0x1dc   :  { %v453_v13 = vpop.permute.xlu1 %452  ;;  %v436_v33 = vrot.slane %v399_v26, %v1018_v3  ;;  %v432_v1 = vsel %vm138_vm3, %v431_v38, %v427_v31 }
 0x1dd   :  { %v478_v9 = vrot.slane %v453_v13, %v1004_v59 }
 0x1de   :  { %v437_v61 = vsel %vm145_vm4, %v436_v33, %v432_v1 }
 0x1df   :  { %v474_v49 = vpop.permute.xlu0 %473 }
 0x1e0   :  { %v456_v58 = vpop.permute.xlu1 %455  ;;  %v511_v22 = vrot.slane %v474_v49, %v1018_v3 }
 0x1e1   :  { %v482_v44 = vrot.slane %v456_v58, %v997_v56 }
 0x1e4   :  { %v465_v17 = vpop.permute.xlu1 %464 }
 0x1e5   :  { %v497_v36 = vrot.slane %v465_v17, %v1004_v59 }
 0x1e8   :  { %v468_v63 = vpop.permute.xlu1 %467 }
 0x1e9   :  { %v501_v30 = vrot.slane %v468_v63, %v997_v56  ;;  %v483_v63 = vsel %vm131_vm2, %v482_v44, %v478_v9 }
 0x1eb   :  { %v502_v45 = vsel %vm131_vm2, %v501_v30, %v497_v36 }
 0x1ec   :  { %v384_v23 = vpop.permute.xlu1 %383  ;;  %v507_v17 = vsel %vm138_vm3, %v506_v48, %v502_v45 }
 0x1ed   :  { %v412_v11 = vrot.slane %v384_v23, %v1011_v62 }
 0x1ef   :  { %v413_v54 = vsel %vm138_vm3, %v412_v11, %v408_v15 }
 0x1f0   :  { %v459_v14 = vpop.permute.xlu1 %458 }
 0x1f1   :  { %v487_v55 = vrot.slane %v459_v14, %v1011_v62  ;;  %v512_v14 = vsel %vm145_vm4, %v511_v22, %v507_v17 }
 0x1f3   :  { %v488_v26 = vsel %vm138_vm3, %v487_v55, %v483_v63 }
 0x1f4   :  { %v387_v40 = vpop.permute.xlu1 %386 }
 0x1f5   :  { %v417_v47 = vrot.slane %v387_v40, %v1018_v3 }
 0x1f7   :  { %v418_v12 = vsel %vm145_vm4, %v417_v47, %v413_v54 }
 0x1f8   :  { %v462_v58 = vpop.permute.xlu1 %461  ;;  %v438_v60 = vsel %vm166_vm5, %v437_v61, %v418_v12 }
 0x1f9   :  { %v492_v23 = vrot.slane %v462_v58, %v1018_v3  ;;  %v440_v25 = vsel %vm243_vm7, %v438_v60, 0.0 }
 0x1fa   :  { %441 = vadd.xlane.f32.xlu1 %v440_v25 }
 0x1fb   :  { %v493_v13 = vsel %vm145_vm4, %v492_v23, %v488_v26 }
 0x1fc   :  { %v513_v6 = vsel %vm166_vm5, %v512_v14, %v493_v13 }
 0x1fd   :  { %v515_v28 = vsel %vm243_vm7, %v513_v6, 0.0 }
 0x1fe   :  { %516 = vadd.xlane.f32.xlu0 %v515_v28 }
 0x287   :  { %v442_v30 = vpop.xlane.xlu1 %441 }
 0x28b   :  { %v517_v29 = vpop.xlane.xlu0 %516 }
 0x28c   :  { %853 = vrcp.f32 %v517_v29 }
 0x28d   :  { %855 = vlog2.f32 %v517_v29 }
 0x28e   :  { %857 = vlog2.f32 %v442_v30 }
 0x296   :  { %v854_v11 = vpop.eup %853 }
 0x297   :  { %v565_v31 = vrot.slane %v854_v11, %v1089_v52  ;;  %v569_v33 = vrot.slane %v854_v11, %v1092_v53  ;;  %v856_v36 = vpop.eup %855 }
 0x298   :  { %v858_v38 = vpop.eup %857  ;;  %v540_v47 = vmul.f32 0.6931472, %v856_v36 }
 0x299   :  { %v573_v40 = vmul.f32 %v1158_v0, %v565_v31  ;;  %v572_v15 = vmul.f32 %v1148_v34, %v565_v31  ;;  %v576_v44 = vmul.f32 %v1165_v41, %v569_v33  ;;  %v577_v45 = vmul.f32 %v1175_v19, %v569_v33 }
 0x29a   :  { %v519_v48 = vmul.f32 0.6931472, %v858_v38  ;;  %v574_v0 = vmul.f32 %v1179_v46, %v565_v31  ;;  %v578_v34 = vmul.f32 %v1150_v10, %v569_v33  ;;  %v545_v41 = vrot.slane %v540_v47, %v1089_v52 }
 0x29b   :  { %vm587_vm8 = vcmp.gt.f32.partialorder %v573_v40, 0.0  ;;  %vm586_vm9 = vcmp.gt.f32.partialorder %v572_v15, 0.0  ;;  %vm590_vm10 = vcmp.gt.f32.partialorder %v576_v44, 0.0  ;;  %vm591_vm11 = vcmp.gt.f32.partialorder %v577_v45, 0.0 }
 0x29c   :  { %v597_v49 = vsel %vm587_vm8, 1, %v886_v50  ;;  %v596_v54 = vsel %vm586_vm9, 1, %v886_v50  ;;  %v524_v19 = vrot.slane %v519_v48, %v1089_v52  ;;  %v600_v55 = vsel %vm590_vm10, 1, %v886_v50 }
 0x29d   :  { %608 = vperm.xlu1 %820, %v597_v49   ;;  %605 = vperm.xlu0 %819, %v596_v54   ;;  %v601_v1 = vsel %vm591_vm11, 1, %v886_v50  ;;  %vm588_vm12 = vcmp.gt.f32.partialorder %v574_v0, 0.0  ;;  %vm592_vm13 = vcmp.gt.f32.partialorder %v578_v34, 0.0  ;;  %v575_v9 = vmul.f32 %v1182_v35, %v565_v31 }
 0x29e   :  { %v579_v12 = vmul.f32 %v1167_v42, %v569_v33  ;;  %v549_v46 = vrot.slane %v540_v47, %v1092_v53  ;;  %v553_v10 = vsub.f32 %v1125_v57, %v545_v41  ;;  %v552_v61 = vsub.f32 %v1119_v20, %v545_v41 }
 0x29f   :  { %v528_v52 = vrot.slane %v519_v48, %v1092_v53  ;;  %v598_v58 = vsel %vm588_vm12, 1, %v886_v50  ;;  %v602_v60 = vsel %vm592_vm13, 1, %v886_v50  ;;  %vm589_vm14 = vcmp.gt.f32.partialorder %v575_v9, 0.0 }
 0x2a0   :  { %vm593_vm15 = vcmp.gt.f32.partialorder %v579_v12, 0.0  ;;  %v532_v35 = vsub.f32 %v1100_v4, %v524_v19  ;;  %v531_v42 = vsub.f32 %v1097_v2, %v524_v19  ;;  %v557_v57 = vsub.f32 %v1140_v18, %v549_v46 }
 0x2a1   :  { %617 = vperm.xlu1 %820, %v600_v55   ;;  %620 = vperm.xlu0 %819, %v601_v1   ;;  %v556_v20 = vsub.f32 %v1133_v7, %v549_v46  ;;  %v599_v53 = vsel %vm589_vm14, 1, %v886_v50  ;;  %v603_v22 = vsel %vm593_vm15, 1, %v886_v50  ;;  %v536_v23 = vsub.f32 %v1111_v16, %v528_v52 }
 0x2a2   :  { %v670_v17 = vsub.f32 %v553_v10, %v532_v35  ;;  %v669_v63 = vsub.f32 %v552_v61, %v531_v42  ;;  %v535_v25 = vsub.f32 %v1103_v5, %v528_v52  ;;  %v558_v4 = vsub.f32 %v1122_v21, %v549_v46 }
 0x2a3   :  { %v554_v2 = vsub.f32 %v1155_v37, %v545_v41  ;;  %v674_v14 = vsub.f32 %v557_v57, %v536_v23  ;;  %v537_v7 = vsub.f32 %v1106_v8, %v528_v52  ;;  %v533_v50 = vsub.f32 %v1145_v32, %v524_v19 }
 0x2a4   :  { %v678_v26 = vmul.f32 %v670_v17, %v573_v40  ;;  %v677_v13 = vmul.f32 %v669_v63, %v572_v15  ;;  %v673_v18 = vsub.f32 %v556_v20, %v535_v25  ;;  %v559_v28 = vsub.f32 %v1137_v27, %v549_v46 }
 0x2a5   :  { %611 = vperm.xlu1 %820, %v598_v58   ;;  %623 = vperm.xlu0 %819, %v602_v60   ;;  %v675_v6 = vsub.f32 %v558_v4, %v537_v7  ;;  %v682_v16 = vmul.f32 %v674_v14, %v577_v45  ;;  %v671_v5 = vsub.f32 %v554_v2, %v533_v50 }
 0x2a6   :  { %v681_v29 = vmul.f32 %v673_v18, %v576_v44  ;;  %v555_v21 = vsub.f32 %v1172_v43, %v545_v41  ;;  %v538_v37 = vsub.f32 %v1129_v24, %v528_v52  ;;  %v534_v30 = vsub.f32 %v1162_v39, %v524_v19 }
 0x2a7   :  { %v683_v11 = vmul.f32 %v675_v6, %v578_v34  ;;  %v679_v8 = vmul.f32 %v671_v5, %v574_v0 }
 0x2a8   :  { %v676_v31 = vsub.f32 %v559_v28, %v538_v37  ;;  %v672_v33 = vsub.f32 %v555_v21, %v534_v30 }
 0x2a9   :  { %614 = vperm.xlu1 %820, %v599_v53   ;;  %626 = vperm.xlu0 %819, %v603_v22  }
 0x2aa   :  { %v684_v32 = vmul.f32 %v676_v31, %v579_v12  ;;  %v680_v36 = vmul.f32 %v672_v33, %v575_v9 }
 0x2ad   :  { %697 = vperm.xlu0 %819, %v678_v26   ;;  %694 = vperm.xlu1 %820, %v677_v13  }
 0x2b1   :  { %709 = vperm.xlu0 %819, %v682_v16   ;;  %706 = vperm.xlu1 %820, %v681_v29  }
 0x2b5   :  { %712 = vperm.xlu0 %819, %v683_v11   ;;  %700 = vperm.xlu1 %820, %v679_v8  }
 0x2b9   :  { %715 = vperm.xlu0 %819, %v684_v32   ;;  %703 = vperm.xlu1 %820, %v680_v36  }
 0x31c   :  { %v609_v27 = vpop.permute.xlu1 %608  ;;  %v606_v38 = vpop.permute.xlu0 %605 }
 0x31d   :  { %v635_v39 = vrot.slane %v609_v27, %v997_v56  ;;  %v631_v47 = vrot.slane %v606_v38, %v1004_v59 }
 0x31f   :  { %v636_v1 = vsel %vm131_vm2, %v635_v39, %v631_v47 }
 0x320   :  { %v618_v40 = vpop.permute.xlu1 %617  ;;  %v621_v43 = vpop.permute.xlu0 %620 }
 0x321   :  { %v650_v48 = vrot.slane %v618_v40, %v1004_v59  ;;  %v654_v49 = vrot.slane %v621_v43, %v997_v56 }
 0x323   :  { %v655_v9 = vsel %vm131_vm2, %v654_v49, %v650_v48 }
 0x324   :  { %v612_v15 = vpop.permute.xlu1 %611  ;;  %v624_v44 = vpop.permute.xlu0 %623 }
 0x325   :  { %v640_v54 = vrot.slane %v612_v15, %v1011_v62  ;;  %v659_v0 = vrot.slane %v624_v44, %v1011_v62 }
 0x327   :  { %v641_v12 = vsel %vm138_vm3, %v640_v54, %v636_v1  ;;  %v660_v46 = vsel %vm138_vm3, %v659_v0, %v655_v9 }
 0x328   :  { %v615_v45 = vpop.permute.xlu1 %614  ;;  %v627_v24 = vpop.permute.xlu0 %626 }
 0x329   :  { %v645_v19 = vrot.slane %v615_v45, %v1018_v3  ;;  %v664_v55 = vrot.slane %v627_v24, %v1018_v3 }
 0x32b   :  { %v646_v52 = vsel %vm145_vm4, %v645_v19, %v641_v12  ;;  %v665_v58 = vsel %vm145_vm4, %v664_v55, %v660_v46 }
 0x32c   :  { %v698_v34 = vpop.permute.xlu0 %697  ;;  %v695_v41 = vpop.permute.xlu1 %694  ;;  %v666_v42 = vsel %vm166_vm5, %v665_v58, %v646_v52 }
 0x32d   :  { %v724_v17 = vrot.slane %v698_v34, %v997_v56  ;;  %v720_v63 = vrot.slane %v695_v41, %v1004_v59  ;;  %vm667_vm1 = vcmp.ne.s32.totalorder %v666_v42, 0 }
 0x32e   :  { %vm668_vm6 = vmand %vm585_vm0, %vm667_vm1 }
 0x32f   :  { %v725_v4 = vsel %vm131_vm2, %v724_v17, %v720_v63 }
 0x330   :  { %v710_v10 = vpop.permute.xlu0 %709  ;;  %v707_v61 = vpop.permute.xlu1 %706 }
 0x331   :  { %v743_v57 = vrot.slane %v710_v10, %v997_v56  ;;  %v739_v20 = vrot.slane %v707_v61, %v1004_v59 }
 0x333   :  { %v744_v2 = vsel %vm131_vm2, %v743_v57, %v739_v20 }
 0x334   :  { %v713_v60 = vpop.permute.xlu0 %712  ;;  %v701_v35 = vpop.permute.xlu1 %700 }
 0x335   :  { %v748_v53 = vrot.slane %v713_v60, %v1011_v62  ;;  %v729_v22 = vrot.slane %v701_v35, %v1011_v62 }
 0x337   :  { %v749_v56 = vsel %vm138_vm3, %v748_v53, %v744_v2  ;;  %v730_v59 = vsel %vm138_vm3, %v729_v22, %v725_v4 }
 0x338   :  { %v716_v23 = vpop.permute.xlu0 %715  ;;  %v704_v25 = vpop.permute.xlu1 %703 }
 0x339   :  { %v753_v26 = vrot.slane %v716_v23, %v1018_v3  ;;  %v734_v13 = vrot.slane %v704_v25, %v1018_v3 }
 0x33b   :  { %v735_v14 = vsel %vm145_vm4, %v734_v13, %v730_v59  ;;  %v754_v62 = vsel %vm145_vm4, %v753_v26, %v749_v56 }
 0x33c   :  { %v755_v51 = vsel %vm166_vm5, %v754_v62, %v735_v14 }
 0x33d   :  { %v757_v18 = vsel %vm668_vm6, %v755_v51, 0.0 }
 0x33e   :  { %v758_v7 = vsel %vm243_vm7, %v757_v18, 0.0 }
 0x33f   :  { %759 = vadd.xlane.f32.xlu1 %v758_v7 }
 0x340   :  { %870 = shalt.err (!%p867_p4)
}
 0x341   :  { %s871_s11 = scalar_lea.hbm %s1309_s4, 32 }
 0x342   :  { %p872_p5 = scmp.ne.s32.totalorder %s1309_s4, %s871_s11  ;;  %p875_p6 = scmp.lt.u32.totalorder %s871_s11, %s1309_s4 }
 0x344   :  { %p877_p7 = pnand %p875_p6, %p872_p5 }
 0x346   :  { %880 = shalt.err (!%p877_p7)
}
 0x347   :  { %779 = dma.vmem_to_hbm [thread:$0]  %s777_s7, 32, %s1309_s4, [#allocation3]  }
 0x3cc   :  { %v760_v3 = vpop.xlane.xlu1 %759 }
 0x3cd   :  { %v761_v50 = vrot.slane %v760_v3, 4 }
 0x3cf   :  { %v762_v6 = vadd.f32 %v761_v50, %v760_v3 }
 0x3d1   :  { %v763_v28 = vrot.slane %v762_v6, 2 }
 0x3d3   :  { %v764_v16 = vadd.f32 %v763_v28, %v762_v6 }
 0x3d5   :  { %v765_v29 = vrot.slane %v764_v16, 1 }
 0x3d7   :  { %v766_v5 = vadd.f32 %v765_v29, %v764_v16 }
 0x3d9   :  { %812 = vpush %v766_v5 }
 0x40a   :  { %s813_s18 = spop %812 }
 0x40b   :  { %v768_v21 = vstv %s813_s18 }
 0x40c   :  { %769 = vst [vmem:[%s1310_s5] sm:$0xff] %v768_v21 }
 0x40d   :  { %881 = dma.done.wait [#allocation3], 32  }
 0x40e   :  { %882 = vsyncadd [#allocation3], 4294967264 }
 0x40f   :  { %787 = vsyncpa [#allocation3], 1 }

</bundles_post_ra>
